<compile_context>
chip_gen: v7x
topology: tpu7x:2x2x1
jax: 0.10.0
libtpu: 0.0.40
codegen_flags: <defaults>
</compile_context>

<pallas_src>
import functools

import jax
import jax.numpy as jnp
from jax import lax
from jax.experimental import pallas as pl
from jax.experimental.pallas import tpu as pltpu


def _dyn_conv_kernel(alpha_ref, x_ref, w_ref, b_ref, o_ref, *, kh, kw, Wp, M):
    # alpha_ref: (B*M,)                 SMEM, softmax gate weights (scalar reads)
    # x_ref    : (1, Cin, L_pad)        VMEM, zero-padded image, spatially flattened
    # w_ref    : (M, kh*kw, Cout, Cin)  VMEM, expert kernels, tap-major (resident)
    # b_ref    : (M, Cout, 1)           VMEM, expert biases (resident)
    # o_ref    : (1, Cout, Hout*Wp)     VMEM, "wide" output (cols w >= Wout are junk)
    b = pl.program_id(0)

    # --- expert mixing on the VPU in f32 (v5e has no bf16 VPU), unrolled over M ---
    a0 = alpha_ref[b * M + 0]
    wcomb = a0 * w_ref[0]                      # (kk, Cout, Cin) f32
    bcomb = a0 * b_ref[0]                      # (Cout, 1)       f32
    for m in range(1, M):
        a_m = alpha_ref[b * M + m]
        wcomb = wcomb + a_m * w_ref[m]
        bcomb = bcomb + a_m * b_ref[m]

    xv = x_ref[0]                              # (Cin, L_pad), compute dtype (bf16 or f32)
    cdt = xv.dtype
    Cout = o_ref.shape[1]
    HWL = o_ref.shape[2]                       # Hout * Wp (lane-dense, >= 128)

    # --- implicit im2col: one small MXU matmul per kernel tap, f32 accumulate ---
    acc = jnp.zeros((Cout, HWL), jnp.float32)
    for i in range(kh):
        for j in range(kw):
            s = i * Wp + j                               # static lane shift
            rhs = xv[:, s:s + HWL]                       # (Cin, HWL) shifted padded image
            lhs = wcomb[i * kw + j].astype(cdt)          # (Cout, Cin) mixed tap weights
            acc = acc + jnp.dot(lhs, rhs, preferred_element_type=jnp.float32)

    o_ref[0] = (acc + bcomb).astype(o_ref.dtype)


def dynamic_conv2d(x, weight, expert_bias, gate_w, gate_b,
                   stride=(1, 1), padding=(0, 0), dilation=(1, 1), groups=1,
                   compute_dtype=jnp.bfloat16):
    """
    x           : (B, C, H, W)             float32, NCHW
    weight      : (M, Cout, Cin, kh, kw)   expert kernels
    expert_bias : (M, Cout)
    gate_w      : (M, C)  (PyTorch Linear layout: out_features x in_features)
    gate_b      : (M,)
    compute_dtype: dtype for the MXU matmul operands (bf16 on v6e/v7x halves the
                   dominant HBM traffic; use jnp.float32 for a bit-tighter result).
    """
    B, C, H, W = x.shape
    M, Cout, Cin, kh, kw = weight.shape
    sh, sw = stride
    ph, pw = padding
    dh, dw = dilation
    assert groups == 1, "TODO(synk): groups != 1 not implemented"
    assert (dh, dw) == (1, 1), "TODO(synk): dilation != 1 not implemented"
    assert (sh, sw) == (1, 1), "TODO(synk): stride != 1 not implemented"
    assert Cin == C

    Hp, Wp = H + 2 * ph, W + 2 * pw
    Hout = Hp - kh + 1
    Wout = Wp - kw + 1
    HWL = Hout * Wp                                  # "wide" output columns per image
    # flat length so every tap's shifted slice stays in bounds; round up to lanes
    L_need = (kh - 1) * Wp + (kw - 1) + HWL
    L_pad = ((max(L_need, Hp * Wp) + 127) // 128) * 128

    # --- gating (tiny BxC / BxM work): hoisted out of the kernel ---
    gap = jnp.mean(x, axis=(2, 3))                               # (B, C)
    logits = gap @ gate_w.T + gate_b                             # (B, M)
    alpha = jax.nn.softmax(logits, axis=1).astype(jnp.float32).reshape(B * M)

    # --- single 1x pass over x: spatial zero-pad, flatten, lane-pad, dtype cast ---
    x_pad = jnp.pad(x, ((0, 0), (0, 0), (ph, ph), (pw, pw))).reshape(B, C, Hp * Wp)
    x_flat = jnp.pad(x_pad, ((0, 0), (0, 0), (0, L_pad - Hp * Wp))).astype(compute_dtype)

    # expert kernels tap-major: wcomb[tap] is a clean leading-dim (Cout, Cin) slice
    w4 = jnp.transpose(weight, (0, 3, 4, 1, 2)).reshape(M, kh * kw, Cout, Cin)
    w4 = w4.astype(jnp.float32)
    eb3 = expert_bias.reshape(M, Cout, 1).astype(jnp.float32)

    kernel = functools.partial(_dyn_conv_kernel, kh=kh, kw=kw, Wp=Wp, M=M)
    out_wide = pl.pallas_call(
        kernel,
        out_shape=jax.ShapeDtypeStruct((B, Cout, HWL), jnp.float32),
        grid=(B,),
        in_specs=[
            pl.BlockSpec(memory_space=pltpu.MemorySpace.SMEM),            # alpha (B*M,)
            pl.BlockSpec((1, C, L_pad), lambda b: (b, 0, 0)),             # padded image
            pl.BlockSpec((M, kh * kw, Cout, Cin), lambda b: (0, 0, 0, 0)),# kernels (resident)
            pl.BlockSpec((M, Cout, 1), lambda b: (0, 0, 0)),              # biases (resident)
        ],
        out_specs=pl.BlockSpec((1, Cout, HWL), lambda b: (b, 0, 0)),
        compiler_params=pltpu.CompilerParams(
            dimension_semantics=("parallel",),          # B=2 even -> shards over v7x's 2 TCs
            vmem_limit_bytes=32 * 1024 * 1024),
    )(alpha, x_flat, w4, eb3)

    # drop the junk columns (w >= Wout) of the wide layout; cheap XLA slice
    out = out_wide.reshape(B, Cout, Hout, Wp)[:, :, :, :Wout]
    return out


def _reference(x, weight, expert_bias, gate_w, gate_b, stride, padding):
    """Pure-JAX reference mirroring the PyTorch forward."""
    B = x.shape[0]
    gap = jnp.mean(x, axis=(2, 3))                                  # (B, C)
    logits = gap @ gate_w.T + gate_b
    alpha = jax.nn.softmax(logits, axis=1)                          # (B, M)
    combined = jnp.einsum('bm,mocij->bocij', alpha, weight)         # (B, Cout, Cin, kh, kw)
    biases = alpha @ expert_bias                                    # (B, Cout)
    outs = []
    for i in range(B):
        o = lax.conv_general_dilated(
            x[i:i + 1], combined[i],
            window_strides=stride,
            padding=[(padding[0], padding[0]), (padding[1], padding[1])],
            dimension_numbers=('NCHW', 'OIHW', 'NCHW'))
        outs.append(o + biases[i][None, :, None, None])
    return jnp.concatenate(outs, axis=0)


if __name__ == "__main__":
    # Module instantiation: in_channels=4, out_channels=8, kernel_size=3,
    # stride=1, padding=1, num_experts=4, bias=True.
    B, C, H, W = 2, 4, 16, 16
    Cout, k, M = 8, 3, 4
    stride, padding = (1, 1), (1, 1)

    key = jax.random.PRNGKey(0)
    kx, kw_, keb, kgw, kgb = jax.random.split(key, 5)

    x = jax.random.normal(kx, (B, C, H, W), dtype=jnp.float32)
    weight = jax.random.normal(kw_, (M, Cout, C, k, k), dtype=jnp.float32) * 0.02
    expert_bias = jax.random.normal(keb, (M, Cout), dtype=jnp.float32) * 0.05
    gate_w = jax.random.normal(kgw, (M, C), dtype=jnp.float32) * 0.1
    gate_b = jax.random.normal(kgb, (M,), dtype=jnp.float32) * 0.1

    ref = _reference(x, weight, expert_bias, gate_w, gate_b, stride, padding)

    # f32 matmul path: tight structural check.
    out_f32 = dynamic_conv2d(x, weight, expert_bias, gate_w, gate_b,
                             stride=stride, padding=padding,
                             compute_dtype=jnp.float32)
    out_f32 = jax.block_until_ready(out_f32)
    assert out_f32.shape == (B, Cout, H, W), out_f32.shape
    assert jnp.allclose(out_f32, ref, rtol=5e-3, atol=5e-3), \
        float(jnp.max(jnp.abs(out_f32 - ref)))

    # bf16 matmul path (default; halves DMA bytes on v6e/v7x): looser tolerance.
    out_bf16 = dynamic_conv2d(x, weight, expert_bias, gate_w, gate_b,
                              stride=stride, padding=padding,
                              compute_dtype=jnp.bfloat16)
    out_bf16 = jax.block_until_ready(out_bf16)
    assert out_bf16.shape == (B, Cout, H, W), out_bf16.shape
    assert jnp.allclose(out_bf16, ref, rtol=2e-2, atol=2e-2), \
        float(jnp.max(jnp.abs(out_bf16 - ref)))

    print("KERNEL_OK")
</pallas_src>

<mosaic_0001>
module attributes {stable_mosaic.version = 11 : i64} {
  func.func @_dyn_conv_kernel(%arg0: i32, %arg1: memref<8xf32, #tpu.memory_space<smem>>, %arg2: memref<1x4x384xf32, #tpu.memory_space<vmem>>, %arg3: memref<4x9x8x4xf32, #tpu.memory_space<vmem>>, %arg4: memref<4x8x1xf32, #tpu.memory_space<vmem>>, %arg5: memref<1x8x288xf32, #tpu.memory_space<vmem>>) attributes {dimension_semantics = [#tpu.dimension_semantics<parallel>], iteration_bounds = array<i64: 2>, scalar_prefetch = 0 : i64, scratch_operands = 0 : i64, tpu.core_type = #tpu.core_type<tc>, window_params = [{transform_indices = @transform_0, window_bounds = array<i64: 8>}, {transform_indices = @transform_1, window_bounds = array<i64: 1, 4, 384>}, {pipeline_mode = #tpu.pipeline_mode<synchronous>, transform_indices = @transform_2, window_bounds = array<i64: 4, 9, 8, 4>}, {pipeline_mode = #tpu.pipeline_mode<synchronous>, transform_indices = @transform_3, window_bounds = array<i64: 4, 8, 1>}, {transform_indices = @transform_4, window_bounds = array<i64: 1, 8, 288>}]} {
    %c4_i32 = arith.constant 4 : i32
    %0 = arith.muli %arg0, %c4_i32 : i32
    %c0_i32 = arith.constant 0 : i32
    %1 = arith.addi %0, %c0_i32 : i32
    %2 = arith.index_cast %1 : i32 to index
    %3 = memref.load %arg1[%2] : memref<8xf32, #tpu.memory_space<smem>>
    %c0 = arith.constant 0 : index
    %c0_0 = arith.constant 0 : index
    %c0_1 = arith.constant 0 : index
    %c0_2 = arith.constant 0 : index
    %4 = vector.load %arg3[%c0, %c0_0, %c0_1, %c0_2] : memref<4x9x8x4xf32, #tpu.memory_space<vmem>>, vector<1x9x8x4xf32>
    %5 = vector.shape_cast %4 : vector<1x9x8x4xf32> to vector<9x8x4xf32>
    %6 = vector.broadcast %3 : f32 to vector<9x8x4xf32>
    %7 = arith.mulf %6, %5 : vector<9x8x4xf32>
    %c0_3 = arith.constant 0 : index
    %c0_4 = arith.constant 0 : index
    %c0_5 = arith.constant 0 : index
    %8 = vector.load %arg4[%c0_3, %c0_4, %c0_5] : memref<4x8x1xf32, #tpu.memory_space<vmem>>, vector<1x8x1xf32>
    %9 = vector.shape_cast %8 : vector<1x8x1xf32> to vector<8x1xf32>
    %10 = vector.broadcast %3 : f32 to vector<8x1xf32>
    %11 = arith.mulf %10, %9 : vector<8x1xf32>
    %c4_i32_6 = arith.constant 4 : i32
    %12 = arith.muli %arg0, %c4_i32_6 : i32
    %c1_i32 = arith.constant 1 : i32
    %13 = arith.addi %12, %c1_i32 : i32
    %14 = arith.index_cast %13 : i32 to index
    %15 = memref.load %arg1[%14] : memref<8xf32, #tpu.memory_space<smem>>
    %c1 = arith.constant 1 : index
    %c0_7 = arith.constant 0 : index
    %c0_8 = arith.constant 0 : index
    %c0_9 = arith.constant 0 : index
    %16 = vector.load %arg3[%c1, %c0_7, %c0_8, %c0_9] : memref<4x9x8x4xf32, #tpu.memory_space<vmem>>, vector<1x9x8x4xf32>
    %17 = vector.shape_cast %16 : vector<1x9x8x4xf32> to vector<9x8x4xf32>
    %18 = vector.broadcast %15 : f32 to vector<9x8x4xf32>
    %19 = arith.mulf %18, %17 : vector<9x8x4xf32>
    %20 = arith.addf %7, %19 : vector<9x8x4xf32>
    %c1_10 = arith.constant 1 : index
    %c0_11 = arith.constant 0 : index
    %c0_12 = arith.constant 0 : index
    %21 = vector.load %arg4[%c1_10, %c0_11, %c0_12] : memref<4x8x1xf32, #tpu.memory_space<vmem>>, vector<1x8x1xf32>
    %22 = vector.shape_cast %21 : vector<1x8x1xf32> to vector<8x1xf32>
    %23 = vector.broadcast %15 : f32 to vector<8x1xf32>
    %24 = arith.mulf %23, %22 : vector<8x1xf32>
    %25 = arith.addf %11, %24 : vector<8x1xf32>
    %c4_i32_13 = arith.constant 4 : i32
    %26 = arith.muli %arg0, %c4_i32_13 : i32
    %c2_i32 = arith.constant 2 : i32
    %27 = arith.addi %26, %c2_i32 : i32
    %28 = arith.index_cast %27 : i32 to index
    %29 = memref.load %arg1[%28] : memref<8xf32, #tpu.memory_space<smem>>
    %c2 = arith.constant 2 : index
    %c0_14 = arith.constant 0 : index
    %c0_15 = arith.constant 0 : index
    %c0_16 = arith.constant 0 : index
    %30 = vector.load %arg3[%c2, %c0_14, %c0_15, %c0_16] : memref<4x9x8x4xf32, #tpu.memory_space<vmem>>, vector<1x9x8x4xf32>
    %31 = vector.shape_cast %30 : vector<1x9x8x4xf32> to vector<9x8x4xf32>
    %32 = vector.broadcast %29 : f32 to vector<9x8x4xf32>
    %33 = arith.mulf %32, %31 : vector<9x8x4xf32>
    %34 = arith.addf %20, %33 : vector<9x8x4xf32>
    %c2_17 = arith.constant 2 : index
    %c0_18 = arith.constant 0 : index
    %c0_19 = arith.constant 0 : index
    %35 = vector.load %arg4[%c2_17, %c0_18, %c0_19] : memref<4x8x1xf32, #tpu.memory_space<vmem>>, vector<1x8x1xf32>
    %36 = vector.shape_cast %35 : vector<1x8x1xf32> to vector<8x1xf32>
    %37 = vector.broadcast %29 : f32 to vector<8x1xf32>
    %38 = arith.mulf %37, %36 : vector<8x1xf32>
    %39 = arith.addf %25, %38 : vector<8x1xf32>
    %c4_i32_20 = arith.constant 4 : i32
    %40 = arith.muli %arg0, %c4_i32_20 : i32
    %c3_i32 = arith.constant 3 : i32
    %41 = arith.addi %40, %c3_i32 : i32
    %42 = arith.index_cast %41 : i32 to index
    %43 = memref.load %arg1[%42] : memref<8xf32, #tpu.memory_space<smem>>
    %c3 = arith.constant 3 : index
    %c0_21 = arith.constant 0 : index
    %c0_22 = arith.constant 0 : index
    %c0_23 = arith.constant 0 : index
    %44 = vector.load %arg3[%c3, %c0_21, %c0_22, %c0_23] : memref<4x9x8x4xf32, #tpu.memory_space<vmem>>, vector<1x9x8x4xf32>
    %45 = vector.shape_cast %44 : vector<1x9x8x4xf32> to vector<9x8x4xf32>
    %46 = vector.broadcast %43 : f32 to vector<9x8x4xf32>
    %47 = arith.mulf %46, %45 : vector<9x8x4xf32>
    %48 = arith.addf %34, %47 : vector<9x8x4xf32>
    %c3_24 = arith.constant 3 : index
    %c0_25 = arith.constant 0 : index
    %c0_26 = arith.constant 0 : index
    %49 = vector.load %arg4[%c3_24, %c0_25, %c0_26] : memref<4x8x1xf32, #tpu.memory_space<vmem>>, vector<1x8x1xf32>
    %50 = vector.shape_cast %49 : vector<1x8x1xf32> to vector<8x1xf32>
    %51 = vector.broadcast %43 : f32 to vector<8x1xf32>
    %52 = arith.mulf %51, %50 : vector<8x1xf32>
    %53 = arith.addf %39, %52 : vector<8x1xf32>
    %c0_27 = arith.constant 0 : index
    %c0_28 = arith.constant 0 : index
    %c0_29 = arith.constant 0 : index
    %54 = vector.load %arg2[%c0_27, %c0_28, %c0_29] : memref<1x4x384xf32, #tpu.memory_space<vmem>>, vector<1x4x384xf32>
    %55 = vector.shape_cast %54 : vector<1x4x384xf32> to vector<4x384xf32>
    %cst = arith.constant 0.000000e+00 : f32
    %56 = vector.broadcast %cst : f32 to vector<8x288xf32>
    %57 = vector.extract_strided_slice %55 {offsets = [0, 0], sizes = [4, 288], strides = [1, 1]} : vector<4x384xf32> to vector<4x288xf32>
    %58 = vector.extract_strided_slice %48 {offsets = [0, 0, 0], sizes = [1, 8, 4], strides = [1, 1, 1]} : vector<9x8x4xf32> to vector<1x8x4xf32>
    %59 = vector.shape_cast %58 : vector<1x8x4xf32> to vector<8x4xf32>
    %cst_30 = arith.constant dense<0.000000e+00> : vector<8x288xf32>
    %60 = tpu.matmul %59, %57, %cst_30 {dimension_numbers = #tpu.dot_dimension_numbers<[1], [0], [0], [1], [0, 0, 1, 1], [], []>} : vector<8x4xf32>, vector<4x288xf32>, vector<8x288xf32> -> vector<8x288xf32>
    %61 = arith.addf %56, %60 : vector<8x288xf32>
    %62 = vector.extract_strided_slice %55 {offsets = [0, 1], sizes = [4, 288], strides = [1, 1]} : vector<4x384xf32> to vector<4x288xf32>
    %63 = vector.extract_strided_slice %48 {offsets = [1, 0, 0], sizes = [1, 8, 4], strides = [1, 1, 1]} : vector<9x8x4xf32> to vector<1x8x4xf32>
    %64 = vector.shape_cast %63 : vector<1x8x4xf32> to vector<8x4xf32>
    %cst_31 = arith.constant dense<0.000000e+00> : vector<8x288xf32>
    %65 = tpu.matmul %64, %62, %cst_31 {dimension_numbers = #tpu.dot_dimension_numbers<[1], [0], [0], [1], [0, 0, 1, 1], [], []>} : vector<8x4xf32>, vector<4x288xf32>, vector<8x288xf32> -> vector<8x288xf32>
    %66 = arith.addf %61, %65 : vector<8x288xf32>
    %67 = vector.extract_strided_slice %55 {offsets = [0, 2], sizes = [4, 288], strides = [1, 1]} : vector<4x384xf32> to vector<4x288xf32>
    %68 = vector.extract_strided_slice %48 {offsets = [2, 0, 0], sizes = [1, 8, 4], strides = [1, 1, 1]} : vector<9x8x4xf32> to vector<1x8x4xf32>
    %69 = vector.shape_cast %68 : vector<1x8x4xf32> to vector<8x4xf32>
    %cst_32 = arith.constant dense<0.000000e+00> : vector<8x288xf32>
    %70 = tpu.matmul %69, %67, %cst_32 {dimension_numbers = #tpu.dot_dimension_numbers<[1], [0], [0], [1], [0, 0, 1, 1], [], []>} : vector<8x4xf32>, vector<4x288xf32>, vector<8x288xf32> -> vector<8x288xf32>
    %71 = arith.addf %66, %70 : vector<8x288xf32>
    %72 = vector.extract_strided_slice %55 {offsets = [0, 18], sizes = [4, 288], strides = [1, 1]} : vector<4x384xf32> to vector<4x288xf32>
    %73 = vector.extract_strided_slice %48 {offsets = [3, 0, 0], sizes = [1, 8, 4], strides = [1, 1, 1]} : vector<9x8x4xf32> to vector<1x8x4xf32>
    %74 = vector.shape_cast %73 : vector<1x8x4xf32> to vector<8x4xf32>
    %cst_33 = arith.constant dense<0.000000e+00> : vector<8x288xf32>
    %75 = tpu.matmul %74, %72, %cst_33 {dimension_numbers = #tpu.dot_dimension_numbers<[1], [0], [0], [1], [0, 0, 1, 1], [], []>} : vector<8x4xf32>, vector<4x288xf32>, vector<8x288xf32> -> vector<8x288xf32>
    %76 = arith.addf %71, %75 : vector<8x288xf32>
    %77 = vector.extract_strided_slice %55 {offsets = [0, 19], sizes = [4, 288], strides = [1, 1]} : vector<4x384xf32> to vector<4x288xf32>
    %78 = vector.extract_strided_slice %48 {offsets = [4, 0, 0], sizes = [1, 8, 4], strides = [1, 1, 1]} : vector<9x8x4xf32> to vector<1x8x4xf32>
    %79 = vector.shape_cast %78 : vector<1x8x4xf32> to vector<8x4xf32>
    %cst_34 = arith.constant dense<0.000000e+00> : vector<8x288xf32>
    %80 = tpu.matmul %79, %77, %cst_34 {dimension_numbers = #tpu.dot_dimension_numbers<[1], [0], [0], [1], [0, 0, 1, 1], [], []>} : vector<8x4xf32>, vector<4x288xf32>, vector<8x288xf32> -> vector<8x288xf32>
    %81 = arith.addf %76, %80 : vector<8x288xf32>
    %82 = vector.extract_strided_slice %55 {offsets = [0, 20], sizes = [4, 288], strides = [1, 1]} : vector<4x384xf32> to vector<4x288xf32>
    %83 = vector.extract_strided_slice %48 {offsets = [5, 0, 0], sizes = [1, 8, 4], strides = [1, 1, 1]} : vector<9x8x4xf32> to vector<1x8x4xf32>
    %84 = vector.shape_cast %83 : vector<1x8x4xf32> to vector<8x4xf32>
    %cst_35 = arith.constant dense<0.000000e+00> : vector<8x288xf32>
    %85 = tpu.matmul %84, %82, %cst_35 {dimension_numbers = #tpu.dot_dimension_numbers<[1], [0], [0], [1], [0, 0, 1, 1], [], []>} : vector<8x4xf32>, vector<4x288xf32>, vector<8x288xf32> -> vector<8x288xf32>
    %86 = arith.addf %81, %85 : vector<8x288xf32>
    %87 = vector.extract_strided_slice %55 {offsets = [0, 36], sizes = [4, 288], strides = [1, 1]} : vector<4x384xf32> to vector<4x288xf32>
    %88 = vector.extract_strided_slice %48 {offsets = [6, 0, 0], sizes = [1, 8, 4], strides = [1, 1, 1]} : vector<9x8x4xf32> to vector<1x8x4xf32>
    %89 = vector.shape_cast %88 : vector<1x8x4xf32> to vector<8x4xf32>
    %cst_36 = arith.constant dense<0.000000e+00> : vector<8x288xf32>
    %90 = tpu.matmul %89, %87, %cst_36 {dimension_numbers = #tpu.dot_dimension_numbers<[1], [0], [0], [1], [0, 0, 1, 1], [], []>} : vector<8x4xf32>, vector<4x288xf32>, vector<8x288xf32> -> vector<8x288xf32>
    %91 = arith.addf %86, %90 : vector<8x288xf32>
    %92 = vector.extract_strided_slice %55 {offsets = [0, 37], sizes = [4, 288], strides = [1, 1]} : vector<4x384xf32> to vector<4x288xf32>
    %93 = vector.extract_strided_slice %48 {offsets = [7, 0, 0], sizes = [1, 8, 4], strides = [1, 1, 1]} : vector<9x8x4xf32> to vector<1x8x4xf32>
    %94 = vector.shape_cast %93 : vector<1x8x4xf32> to vector<8x4xf32>
    %cst_37 = arith.constant dense<0.000000e+00> : vector<8x288xf32>
    %95 = tpu.matmul %94, %92, %cst_37 {dimension_numbers = #tpu.dot_dimension_numbers<[1], [0], [0], [1], [0, 0, 1, 1], [], []>} : vector<8x4xf32>, vector<4x288xf32>, vector<8x288xf32> -> vector<8x288xf32>
    %96 = arith.addf %91, %95 : vector<8x288xf32>
    %97 = vector.extract_strided_slice %55 {offsets = [0, 38], sizes = [4, 288], strides = [1, 1]} : vector<4x384xf32> to vector<4x288xf32>
    %98 = vector.extract_strided_slice %48 {offsets = [8, 0, 0], sizes = [1, 8, 4], strides = [1, 1, 1]} : vector<9x8x4xf32> to vector<1x8x4xf32>
    %99 = vector.shape_cast %98 : vector<1x8x4xf32> to vector<8x4xf32>
    %cst_38 = arith.constant dense<0.000000e+00> : vector<8x288xf32>
    %100 = tpu.matmul %99, %97, %cst_38 {dimension_numbers = #tpu.dot_dimension_numbers<[1], [0], [0], [1], [0, 0, 1, 1], [], []>} : vector<8x4xf32>, vector<4x288xf32>, vector<8x288xf32> -> vector<8x288xf32>
    %101 = arith.addf %96, %100 : vector<8x288xf32>
    %102 = vector.broadcast %53 : vector<8x1xf32> to vector<8x288xf32>
    %103 = arith.addf %101, %102 : vector<8x288xf32>
    %c0_39 = arith.constant 0 : index
    %c0_40 = arith.constant 0 : index
    %c0_41 = arith.constant 0 : index
    %104 = vector.load %arg5[%c0_39, %c0_40, %c0_41] : memref<1x8x288xf32, #tpu.memory_space<vmem>>, vector<1x8x288xf32>
    %105 = vector.shape_cast %104 : vector<1x8x288xf32> to vector<8x288xf32>
    %106 = vector.shape_cast %103 : vector<8x288xf32> to vector<1x8x288xf32>
    tpu.vector_store %arg5[%c0_39, %c0_40, %c0_41], %106 {strides = array<i32>} : memref<1x8x288xf32, #tpu.memory_space<vmem>>, vector<1x8x288xf32>,
    return
  }
  func.func @transform_0(%arg0: i32) -> i32 {
    %c0_i32 = arith.constant 0 : i32
    %c0_i32_0 = arith.constant 0 : i32
    return %c0_i32 : i32
  }
  func.func @transform_1(%arg0: i32) -> (i32, i32, i32) {
    %c0_i32 = arith.constant 0 : i32
    %c0_i32_0 = arith.constant 0 : i32
    %c0_i32_1 = arith.constant 0 : i32
    return %arg0, %c0_i32, %c0_i32_0 : i32, i32, i32
  }
  func.func @transform_2(%arg0: i32) -> (i32, i32, i32, i32) {
    %c0_i32 = arith.constant 0 : i32
    %c0_i32_0 = arith.constant 0 : i32
    %c0_i32_1 = arith.constant 0 : i32
    %c0_i32_2 = arith.constant 0 : i32
    %c0_i32_3 = arith.constant 0 : i32
    return %c0_i32, %c0_i32_0, %c0_i32_1, %c0_i32_2 : i32, i32, i32, i32
  }
  func.func @transform_3(%arg0: i32) -> (i32, i32, i32) {
    %c0_i32 = arith.constant 0 : i32
    %c0_i32_0 = arith.constant 0 : i32
    %c0_i32_1 = arith.constant 0 : i32
    %c0_i32_2 = arith.constant 0 : i32
    return %c0_i32, %c0_i32_0, %c0_i32_1 : i32, i32, i32
  }
  func.func @transform_4(%arg0: i32) -> (i32, i32, i32) {
    %c0_i32 = arith.constant 0 : i32
    %c0_i32_0 = arith.constant 0 : i32
    %c0_i32_1 = arith.constant 0 : i32
    return %arg0, %c0_i32, %c0_i32_0 : i32, i32, i32
  }
}

</mosaic_0001>

<bundles_post_ra>
// kernel: tpu_custom_call.1
= control target key start
LH: loop header
LB: loop body
LE: loop exit
PB: predicated region body
PF: predicated region fallthrough
CT: control target
= control target key end

     0   :  { %9 = vsyncpa [#allocation4], 0  ;;  %s2675_s0 = inlined_call_operand.vmem [shape: f32[8], index: 0, kind: input, shape index: {}]   ;;  %s2676_s1 = inlined_call_operand.vmem [shape: f32[2,4,384], index: 1, kind: input, shape index: {}]   ;;  %s2677_s2 = inlined_call_operand.vmem [shape: f32[4,9,8,4], index: 2, kind: input, shape index: {}]   ;;  %s2678_s3 = inlined_call_operand.vmem [shape: f32[4,8,1], index: 3, kind: input, shape index: {}]   ;;  %s2679_s4 = inlined_call_operand.hbm [shape: f32[2,8,288], index: 4, kind: output, shape index: {}]  }
   0x1   :  { %10 = vsyncpa [#allocation3], 0 }
   0x2   :  { %12 = vsyncpa [#allocation3 + $0x1], 0  ;;  %s2238_s15 = smov 0   ;;  %s2240_s16 = smov 0  }
   0x3   :  { %s2242_s17 = smov 0   ;;  %s2244_s18 = smov 0  }
   0x4 LB: > { %s2259_s19 = sadd.s32 4294967295, %s2198_s18   ;;  %s1886_s20 = sadd.s32 4294967294, %s2198_s18   ;;  %s2198_s18 = sphi %s2244_s18, %s2686_s18   ;;  %s2194_s17 = sphi %s2242_s17, %s2685_s17   ;;  %s2190_s16 = sphi %s2240_s16, %s2684_s16   ;;  %s2186_s15 = sphi %s2238_s15, %s2683_s15  }
   0x5   : > { %s2263_s21 = sadd.s32 1, %s2198_s18   ;;  %s114_s22 = sadd.s32 1, %s2194_s17 }
   0x6   : > { %s111_s23 = ssub.s32 %s2198_s18, %s2263_s21  ;;  %p124_p0 = scmp.ne.s32.totalorder %s2194_s17, %s2190_s16 }
   0x7   : > { %p112_p1 = scmp.eq.s32.totalorder %s111_s23, 0  ;;  %p125_p2 = scmp.eq.s32.totalorder %s2259_s19, 1 }
   0x8   : > { %p130_p3 = scmp.ne.s32.totalorder %s2190_s16, %s2186_s15  ;;  %p131_p4 = scmp.eq.s32.totalorder %s1886_s20, 1 }
   0x9   : > { %s2274_s24 = scalar_select %p112_p1, %s2194_s17, %s114_s22  }
   0xa   : > { %p2276_p5 = por %p125_p2, %p124_p0  ;;  %p2280_p6 = por %p131_p4, %p130_p3 }
   0xb   : > { %p1887_p7 = scmp.ge.s32.totalorder %s2198_s18, 1  ;;  %p138_p8 = scmp.lt.s32.totalorder %s2198_s18, 3 }
   0xc   : > { %p2068_p9 = scmp.eq.s32.totalorder %s2259_s19, 0  ;;  %s151_s30 = sshll.u32 %s2675_s0, 4  ;;  %s152_s30 = int_to_ptr.vmem [resolvable:$true] %s151_s30 }
   0xd   : > { %p2287_p10 = pnand %p1887_p7, %p138_p8  ;;  %s2117_s5 = scalar_lea.vmem %s152_s30, 16 }
   0xe   : > { %p2118_p13 = scmp.ne.s32.totalorder %s152_s30, %s2117_s5  ;;  %p2125_p3 = scmp.lt.s32.totalorder %s152_s30, %s152_s30 }
   0xf   : > { %p2060_p11 = pneg %p2287_p10  ;;  %p2126_p4 = scmp.lt.s32.totalorder %s2117_s5, %s2117_s5 }
  0x11   : > { %p2061_p12 = pnand %p2068_p9, %p2060_p11  ;;  %p2127_p7 = por %p2126_p4, %p2125_p3 }
  0x13   : > { %p2119_p0 = pneg %p2061_p12 }
  0x15   : > { %p2120_p1 = pnand %p2119_p0, %p2118_p13 }
  0x17   : > { %p2121_p2 = pneg %p2120_p1 }
  0x19   : > { %p2128_p8 = pnand %p2127_p7, %p2121_p2 }
  0x1b   : > { %2131 = shalt.err (!%p2128_p8)
}
  0x1c   : > { %s2200_s6 = smov [#allocation2]   ;;  %178 = sbr.rel (%p2287_p10) target bundleno = 463 (0x1cf), region = 36 }
  0x1d   : > { %2063 = dma.vmem_to_smem (!%p2061_p12), %s152_s30, 16, %s2200_s6, [#allocation4]  }
  0x23   : > { %2177 = dma.done.wait (%p2068_p9), [#allocation4], 16  }
  0x24   : > { %2179 = vsyncadd (%p2068_p9), [#allocation4], 4294967280 }
  0x25   : > { %184 = sfence }
  0x26   : > { %p205_p11 = scmp.lt.s32.totalorder %s2259_s19, 1  ;;  %v2201_v0 = vmov 0.0   ;;  %s1893_s12 = sshll.u32 %s2259_s19, 2  ;;  %vm2202_vm0 = vmmov 0   ;;  %v215_v6 = vld [vmem:[%s2677_s2 + $0x18] sm:$0xff]  ;;  %v1897_v7 = vld [vmem:[%s2677_s2 + $0x60] sm:$0xff] }
  0x27   : > { %1990 = vmatprep.subr.mxu1 %v2201_v0  ;;  %427 = vmatprep.mubr.f32.mxu0 %v2201_v0  ;;  %s2203_s13 = smov 127   ;;  %s233_s14 = sadd.s32 1, %s1893_s12  ;;  %v1907_v11 = vld [vmem:[%s2677_s2 + $0xa8] sm:$0xff]  ;;  %v1917_v15 = vld [vmem:[%s2677_s2 + $0xf0] sm:$0xff]  ;;  %v216_v18 = vld [vmem:[%s2677_s2 + $0x20] sm:$0xff]  ;;  %vm356_vm1 = vcmask 1043456  }
  0x28   : > { %s206_s7 = scalar_select %p205_p11, %s2259_s19, 1  ;;  %1992 = vmatprep.mubr.msk.f32.mxu1 %vm2202_vm0, %v2201_v0  ;;  %v1898_v19 = vld [vmem:[%s2677_s2 + $0x68] sm:$0xff]  ;;  %v1908_v23 = vld [vmem:[%s2677_s2 + $0xb0] sm:$0xff]  ;;  %v1918_v26 = vld [vmem:[%s2677_s2 + $0xf8] sm:$0xff]  ;;  %vm349_vm2 = vcmask 1039360   ;;  %vm352_vm3 = vcmask 31744  }
  0x29   : > { %s211_s20 = sld [smem:[#allocation2 + %s1893_s12]]  ;;  %s268_s22 = sadd.s32 2, %s1893_s12  ;;  %v217_v27 = vld [vmem:[%s2677_s2 + $0x28] sm:$0xff]  ;;  %v1899_v28 = vld [vmem:[%s2677_s2 + $0x70] sm:$0xff]  ;;  %v1909_v33 = vld [vmem:[%s2677_s2 + $0xb8] sm:$0xff]  ;;  %vm660_vm4 = vcmask 1031168  }
  0x2a   : > { %s2052_s8 = smul.u32 12, %s206_s7  ;;  %s234_s23 = sld [smem:[#allocation2 + %s233_s14]]  ;;  %v1919_v37 = vld [vmem:[%s2677_s2 + $0x100] sm:$0xff]  ;;  %v218_v38 = vld [vmem:[%s2677_s2 + $0x30] sm:$0xff]  ;;  %v1900_v39 = vld [vmem:[%s2677_s2 + $0x78] sm:$0xff]  ;;  %vm822_vm5 = vcmask 900096  }
  0x2b   : > { %s303_s27 = sadd.s32 3, %s1893_s12  ;;  %s2204_s28 = smov 126   ;;  %v1910_v44 = vld [vmem:[%s2677_s2 + $0xc0] sm:$0xff]  ;;  %v1920_v48 = vld [vmem:[%s2677_s2 + $0x108] sm:$0xff]  ;;  %v219_v49 = vld [vmem:[%s2677_s2 + $0x38] sm:$0xff]  ;;  %vm984_vm6 = vcmask 891904  }
  0x2c   : > { %s209_s11 = scalar_lea.vmem %s2676_s1, %s2052_s8  ;;  %s269_s29 = sld [smem:[#allocation2 + %s268_s22]]  ;;  %v1901_v50 = vld [vmem:[%s2677_s2 + $0x80] sm:$0xff]  ;;  %v1911_v55 = vld [vmem:[%s2677_s2 + $0xc8] sm:$0xff]  ;;  %v1921_v59 = vld [vmem:[%s2677_s2 + $0x110] sm:$0xff]  ;;  %vm1146_vm7 = vcmask 883712   ;;  %vm1308_vm8 = vcmask 752640  }
  0x2d   : > { %v2314_v1 = vld [vmem:[%s209_s11] sm:$0xff]  ;;  %v2322_v3 = vld [vmem:[%s209_s11 + $0x8] sm:$0xf]  ;;  %s304_s30 = sld [smem:[#allocation2 + %s303_s27]]  ;;  %s2205_s9 = smov 110   ;;  %vm1470_vm9 = vcmask 744448  }
  0x2e   : > { %343 = vrot.lane.b32.xlu1 %v2314_v1, %s2203_s13  ;;  %v2319_v2 = vcombine.high %v2314_v1, %v2314_v1  ;;  %s2206_s14 = smov 109   ;;  %s2207_s12 = smov 108   ;;  %v220_v60 = vld [vmem:[%s2677_s2 + $0x40] sm:$0xff]  ;;  %v1902_v61 = vld [vmem:[%s2677_s2 + $0x88] sm:$0xff]  ;;  %vm1632_vm10 = vcmask 736256   ;;  %vm1798_vm11 = vcmask 261120  }
  0x2f   : > { %v2328_v4 = vstv %s211_s20  ;;  %s2209_s5 = smov 91   ;;  %s202_s7 = sand.u32 1, %s2190_s16  }
  0x30   : > { %345 = vrot.lane.b32.xlu0 %v2319_v2, %s2203_s13  ;;  %v2330_v5 = vstv %s234_s23  ;;  %v225_v8 = vmul.f32 %v2328_v4, %v215_v6  ;;  %v226_v20 = vmul.f32 %v2328_v4, %v216_v18  ;;  %v227_v31 = vmul.f32 %v2328_v4, %v217_v27  ;;  %v231_v18 = vld [vmem:[%s2678_s3] sm:$0xff]  ;;  %s1801_s22 = scalar_lea.sflag [#allocation3], %s202_s7 }
  0x31   : > { %v249_v9 = vmul.f32 %v1897_v7, %v2330_v5  ;;  %v250_v21 = vmul.f32 %v1898_v19, %v2330_v5  ;;  %v251_v32 = vmul.f32 %v1899_v28, %v2330_v5  ;;  %v228_v41 = vmul.f32 %v2328_v4, %v218_v38  ;;  %v1903_v19 = vld [vmem:[%s2678_s3 + $0x8] sm:$0xff] }
  0x32   : > { %656 = vrot.lane.b32.xlu1 %v2319_v2, %s2204_s28  ;;  %v2341_v10 = vstv %s269_s29  ;;  %v252_v42 = vmul.f32 %v1900_v39, %v2330_v5  ;;  %v229_v53 = vmul.f32 %v2328_v4, %v219_v49  ;;  %v253_v54 = vmul.f32 %v1901_v50, %v2330_v5  ;;  %v1894_v38 = vld [vmem:[%s2677_s2 + $0x48] sm:$0xff] }
  0x33   : > { %v2347_v12 = vstv %s304_s30  ;;  %v258_v13 = vadd.f32 %v249_v9, %v225_v8  ;;  %v284_v14 = vmul.f32 %v1907_v11, %v2341_v10  ;;  %v259_v24 = vadd.f32 %v250_v21, %v226_v20  ;;  %s2208_s30 = smov 92   ;;  %v1912_v8 = vld [vmem:[%s2677_s2 + $0xd0] sm:$0xff] }
  0x34   : > { %347 = vrot.lane.b32.xlu0 %v2322_v3, %s2203_s13  ;;  %v319_v16 = vmul.f32 %v1917_v15, %v2347_v12  ;;  %v285_v25 = vmul.f32 %v1908_v23, %v2341_v10  ;;  %v320_v30 = vmul.f32 %v1918_v26, %v2347_v12  ;;  %v286_v35 = vmul.f32 %v1909_v33, %v2341_v10  ;;  %v1913_v20 = vld [vmem:[%s2678_s3 + $0x10] sm:$0xff]  ;;  %v1923_v26 = vld [vmem:[%s2678_s3 + $0x18] sm:$0xff] }
  0x35   : > { %v293_v17 = vadd.f32 %v284_v14, %v258_v13  ;;  %v260_v36 = vadd.f32 %v251_v32, %v227_v31  ;;  %v321_v40 = vmul.f32 %v1919_v37, %v2347_v12  ;;  %v261_v45 = vadd.f32 %v252_v42, %v228_v41  ;;  %v1922_v14 = vld [vmem:[%s2677_s2 + $0x118] sm:$0xff]  ;;  %v213_v31 = vld [vmem:[%s2677_s2 + $0x8] sm:$0xff]  ;;  %v1895_v32 = vld [vmem:[%s2677_s2 + $0x50] sm:$0xff] }
  0x36   : > { %654 = vrot.lane.b32.xlu1 %v2314_v1, %s2204_s28  ;;  %v294_v29 = vadd.f32 %v285_v25, %v259_v24  ;;  %v287_v46 = vmul.f32 %v1910_v44, %v2341_v10  ;;  %v322_v52 = vmul.f32 %v1920_v48, %v2347_v12  ;;  %v288_v57 = vmul.f32 %v1911_v55, %v2341_v10  ;;  %v212_v37 = vld [vmem:[%s2677_s2] sm:$0xff]  ;;  %v1896_v48 = vld [vmem:[%s2677_s2 + $0x58] sm:$0xff] }
  0x37   : > { %v2364_v22 = vadd.f32 %v319_v16, %v293_v17  ;;  %v295_v43 = vadd.f32 %v286_v35, %v260_v36  ;;  %v262_v58 = vadd.f32 %v253_v54, %v229_v53  ;;  %v323_v62 = vmul.f32 %v1921_v59, %v2347_v12  ;;  %v1905_v36 = vld [vmem:[%s2677_s2 + $0x98] sm:$0xff]  ;;  %v1915_v41 = vld [vmem:[%s2677_s2 + $0xe0] sm:$0xff] }
  0x38   : > { %658 = vrot.lane.b32.xlu0 %v2322_v3, %s2204_s28  ;;  %v2387_v34 = vadd.f32 %v320_v30, %v294_v29  ;;  %v296_v51 = vadd.f32 %v287_v46, %v261_v45  ;;  %v230_v63 = vmul.f32 %v2328_v4, %v220_v60  ;;  %v254_v6 = vmul.f32 %v1902_v61, %v2330_v5  ;;  %v1904_v45 = vld [vmem:[%s2677_s2 + $0x90] sm:$0xff]  ;;  %v1914_v55 = vld [vmem:[%s2677_s2 + $0xd8] sm:$0xff]  ;;  %v1906_v59 = vld [vmem:[%s2677_s2 + $0xa0] sm:$0xff] }
  0x39   : > { %v2409_v47 = vadd.f32 %v321_v40, %v295_v43  ;;  %v297_v7 = vadd.f32 %v288_v57, %v262_v58  ;;  %v289_v11 = vmul.f32 %v1912_v8, %v2341_v10  ;;  %v324_v16 = vmul.f32 %v1922_v14, %v2347_v12  ;;  %v214_v46 = vld [vmem:[%s2677_s2 + $0x10] sm:$0xff] }
  0x3a   : > { %820 = vrot.lane.b32.xlu1 %v2322_v3, %s2205_s9  ;;  %v2427_v56 = vadd.f32 %v322_v52, %v296_v51  ;;  %v263_v9 = vadd.f32 %v254_v6, %v230_v63  ;;  %v2211_v21 = vmov 0   ;;  %v232_v23 = vmul.f32 %v231_v18, %v2328_v4 }
  0x3b   : > { %v2449_v13 = vadd.f32 %v323_v62, %v297_v7  ;;  %2115 = vset.pattern.permute.xlu0 %v2211_v21  ;;  %v266_v24 = vmul.f32 %v1903_v19, %v2330_v5  ;;  %v301_v25 = vmul.f32 %v1913_v20, %v2341_v10  ;;  %v336_v28 = vmul.f32 %v1923_v26, %v2347_v12 }
  0x3c   : > { %818 = vrot.lane.b32.xlu0 %v2319_v2, %s2205_s9  ;;  %v298_v15 = vadd.f32 %v289_v11, %v263_v9  ;;  %v223_v33 = vmul.f32 %v2328_v4, %v213_v31  ;;  %v247_v35 = vmul.f32 %v1895_v32, %v2330_v5  ;;  %v282_v40 = vmul.f32 %v1905_v36, %v2341_v10  ;;  %v1916_v9 = vld [vmem:[%s2677_s2 + $0xe8] sm:$0xff] }
  0x3d   : > { %v267_v27 = vadd.f32 %v266_v24, %v232_v23  ;;  %v222_v43 = vmul.f32 %v2328_v4, %v212_v37  ;;  %v246_v44 = vmul.f32 %v1894_v38, %v2330_v5  ;;  %v317_v51 = vmul.f32 %v1915_v41, %v2347_v12 }
  0x3e   : > { %980 = vrot.lane.b32.xlu1 %v2319_v2, %s2206_s14  ;;  %v2456_v17 = vadd.f32 %v324_v16, %v298_v15  ;;  %v256_v39 = vadd.f32 %v247_v35, %v223_v33  ;;  %v281_v54 = vmul.f32 %v1904_v45, %v2341_v10  ;;  %v224_v57 = vmul.f32 %v2328_v4, %v214_v46 }
  0x3f   : > { %v302_v29 = vadd.f32 %v301_v25, %v267_v27  ;;  %v255_v53 = vadd.f32 %v246_v44, %v222_v43  ;;  %v248_v58 = vmul.f32 %v1896_v48, %v2330_v5  ;;  %v316_v63 = vmul.f32 %v1914_v55, %v2347_v12 }
  0x40   : > { %816 = vrot.lane.b32.xlu0 %v2314_v1, %s2205_s9  ;;  %v291_v50 = vadd.f32 %v282_v40, %v256_v39  ;;  %v283_v6 = vmul.f32 %v1906_v59, %v2341_v10  ;;  %v318_v18 = vmul.f32 %v1916_v9, %v2347_v12  ;;  %s2053_s9 = smul.u32 384, %s2259_s19  ;;  %s2212_s19 = smov [#allocation5]  }
  0x41   : > { %v337_v30 = vadd.f32 %v336_v28, %v302_v29  ;;  %v290_v7 = vadd.f32 %v281_v54, %v255_v53  ;;  %v257_v8 = vadd.f32 %v248_v58, %v224_v57  ;;  %s2136_s23 = sshll.u32 %s2212_s19, 4  ;;  %s2137_s23 = int_to_ptr.vmem [resolvable:$false] %s2136_s23 }
  0x42   : > { %978 = vrot.lane.b32.xlu1 %v2314_v1, %s2206_s14  ;;  %v326_v61 = vadd.f32 %v317_v51, %v291_v50  ;;  %s2633_s20 = scalar_lea.hbm %s2679_s4, %s2053_s9 }
  0x43   : > { %v325_v14 = vadd.f32 %v316_v63, %v290_v7  ;;  %v292_v16 = vadd.f32 %v283_v6, %v257_v8 }
  0x44   : > { %982 = vrot.lane.b32.xlu0 %v2322_v3, %s2206_s14 }
  0x45   : > { %v327_v19 = vadd.f32 %v318_v18, %v292_v16 }
  0x46   : > { %1144 = vrot.lane.b32.xlu1 %v2322_v3, %s2207_s12 }
  0x48   : > { %1142 = vrot.lane.b32.xlu0 %v2319_v2, %s2207_s12 }
  0x4a   : > { %1304 = vrot.lane.b32.xlu1 %v2319_v2, %s2208_s30 }
  0x4c   : > { %1140 = vrot.lane.b32.xlu0 %v2314_v1, %s2207_s12  ;;  %s2138_s12 = scalar_lea.vmem %s2137_s23, 768 }
  0x4e   : > { %1302 = vrot.lane.b32.xlu1 %v2314_v1, %s2208_s30 }
  0x50   : > { %1306 = vrot.lane.b32.xlu0 %v2322_v3, %s2208_s30  ;;  %s2210_s30 = smov 90  }
  0x52   : > { %1468 = vrot.lane.b32.xlu1 %v2322_v3, %s2209_s5 }
  0x54   : > { %1466 = vrot.lane.b32.xlu0 %v2319_v2, %s2209_s5 }
  0x56   : > { %1628 = vrot.lane.b32.xlu1 %v2319_v2, %s2210_s30 }
  0x58   : > { %1464 = vrot.lane.b32.xlu0 %v2314_v1, %s2209_s5 }
  0x5a   : > { %1626 = vrot.lane.b32.xlu1 %v2314_v1, %s2210_s30 }
  0x5c   : > { %1630 = vrot.lane.b32.xlu0 %v2322_v3, %s2210_s30  ;;  %s2051_s30 = smul.u32 24, %s202_s7 }
  0x5e   : > { %s204_s8 = scalar_lea.vmem [#allocation5], %s2051_s30 }
  0x5f   : > { %s1815_s10 = sshll.u32 %s204_s8, 4  ;;  %s2635_s10 = int_to_ptr.vmem [resolvable:$true] %s1815_s10 }
  0x60   : > { %1790 = vperm.xlu0 %2115, %v337_v30   ;;  %s2132_s14 = scalar_lea.vmem %s2635_s10, 384  ;;  %p2139_p13 = scmp.lt.s32.totalorder %s2635_s10, %s2137_s23 }
  0x61   : > { %p2133_p9 = scmp.ne.s32.totalorder %s2635_s10, %s2132_s14  ;;  %p2140_p0 = scmp.lt.s32.totalorder %s2138_s12, %s2132_s14 }
  0x63   : > { %p2134_p10 = pnand %p2133_p9, %p2276_p5  ;;  %p2141_p1 = por %p2140_p0, %p2139_p13 }
  0x65   : > { %p2135_p12 = pneg %p2134_p10 }
  0x67   : > { %p2142_p2 = pnand %p2141_p1, %p2135_p12 }
  0xa0   : > { %v344_v42 = vpop.permute.xlu1 %343 }
  0xa2   : > { %v346_v49 = vpop.permute.xlu0 %345 }
  0xa3   : > { %v350_v4 = vsel %vm349_vm2, %v344_v42, %v346_v49 }
  0xa4   : > { %v657_v52 = vpop.permute.xlu1 %656 }
  0xa6   : > { %v348_v60 = vpop.permute.xlu0 %347 }
  0xa7   : > { %1991 = vmatpush3.msk.msra.mxu1 %vm356_vm1, %v348_v60  ;;  %v351_v62 = vsel %vm349_vm2, %v346_v49, %v348_v60 }
  0xa8   : > { %1924 = vmatprep.subr.msk.mxu0 %vm356_vm1, %v351_v62  ;;  %v655_v5 = vpop.permute.xlu1 %654  ;;  %1993 = vmatmul.mubr.msk.f32.vlgmr.msra.gmra.mrb[0].mxu1 %vm352_vm3, %v326_v61 }
  0xa9   : > { %1925 = vmatpush1.msk.msra.mxu0 %vm356_vm1, %v350_v4  ;;  %1995 = vmatprep.subr.mxu1 %v2201_v0 }
  0xaa   : > { %1926 = vmatmul.mubr.msk.f32.vlgmr.msra.gmra.mrb[0].mxu0 %vm352_vm3, %v326_v61  ;;  %1929 = vmatprep.subr.msk.mxu0 %vm356_vm1, %v2319_v2  ;;  %v659_v10 = vpop.permute.xlu0 %658  ;;  %v661_v2 = vsel %vm660_vm4, %v655_v5, %v657_v52 }
  0xab   : > { %1930 = vmatpush1.msk.msra.mxu0 %vm356_vm1, %v2314_v1  ;;  %v662_v11 = vsel %vm660_vm4, %v657_v52, %v659_v10  ;;  %1996 = vmatpush3.msk.msra.mxu1 %vm356_vm1, %v2322_v3 }
  0xac   : > { %1934 = vmatprep.subr.msk.mxu0 %vm356_vm1, %v662_v11  ;;  %1997 = vmatprep.mubr.msk.f32.mxu1 %vm2202_vm0, %v2201_v0  ;;  %v821_v15 = vpop.permute.xlu1 %820 }
  0xad   : > { %2000 = vmatprep.subr.mxu1 %v2201_v0  ;;  %577 = vmatprep.mubr.f32.mxu0 %v2201_v0 }
  0xae   : > { %1998 = vmatmul.mubr.msk.f32.vlgmr.msra.gmra.mrb[2].mxu1 %vm352_vm3, %v325_v14  ;;  %v819_v1 = vpop.permute.xlu0 %818 }
  0xaf   : > { %2001 = vmatpush3.msk.msra.mxu1 %vm356_vm1, %v659_v10  ;;  %2002 = vmatprep.mubr.msk.f32.mxu1 %vm2202_vm0, %v2201_v0  ;;  %v824_v12 = vsel %vm822_vm5, %v819_v1, %v821_v15 }
  0xb0   : > { %2005 = vmatprep.subr.mxu1 %v2201_v0  ;;  %v981_v3 = vpop.permute.xlu1 %980 }
  0xb2   : > { %1931 = vmatmul.mubr.msk.f32.vlgmr.msra.gmra.mrb[0].mxu0 %vm352_vm3, %v325_v14  ;;  %v817_v20 = vpop.permute.xlu0 %816  ;;  %2003 = vmatmul.mubr.msk.f32.vlgmr.msra.gmra.mrb[4].mxu1 %vm352_vm3, %v327_v19 }
  0xb3   : > { %1935 = vmatpush1.msk.msra.mxu0 %vm356_vm1, %v661_v2  ;;  %736 = vmatprep.mubr.f32.mxu0 %v2201_v0  ;;  %v823_v24 = vsel %vm822_vm5, %v817_v20, %v819_v1 }
  0xb4   : > { %1939 = vmatprep.subr.msk.mxu0 %vm356_vm1, %v824_v12  ;;  %2006 = vmatpush3.msk.msra.mxu1 %vm356_vm1, %v821_v15  ;;  %v979_v21 = vpop.permute.xlu1 %978 }
  0xb5   : > { %2007 = vmatprep.mubr.msk.f32.mxu1 %vm2202_vm0, %v2201_v0  ;;  %2010 = vmatprep.subr.mxu1 %v2201_v0  ;;  %v985_v30 = vsel %vm984_vm6, %v979_v21, %v981_v3 }
  0xb6   : > { %v983_v23 = vpop.permute.xlu0 %982  ;;  %2008 = vmatmul.mubr.msk.f32.vlgmr.msra.gmra.mrb[6].mxu1 %vm352_vm3, %v2364_v22 }
  0xb7   : > { %2011 = vmatpush3.msk.msra.mxu1 %vm356_vm1, %v983_v23  ;;  %2012 = vmatprep.mubr.msk.f32.mxu1 %vm2202_vm0, %v2201_v0  ;;  %v986_v26 = vsel %vm984_vm6, %v981_v3, %v983_v23 }
  0xb8   : > { %v1145_v25 = vpop.permute.xlu1 %1144  ;;  %2015 = vmatprep.subr.mxu1 %v2201_v0 }
  0xba   : > { %1936 = vmatmul.mubr.msk.f32.vlgmr.msra.gmra.mrb[0].mxu0 %vm352_vm3, %v327_v19  ;;  %v1143_v27 = vpop.permute.xlu0 %1142  ;;  %2013 = vmatmul.mubr.msk.f32.vlgmr.msra.gmra.mrb[8].mxu1 %vm352_vm3, %v2387_v34 }
  0xbb   : > { %1940 = vmatpush1.msk.msra.mxu0 %vm356_vm1, %v823_v24  ;;  %898 = vmatprep.mubr.f32.mxu0 %v2201_v0  ;;  %v1148_v32 = vsel %vm1146_vm7, %v1143_v27, %v1145_v25 }
  0xbc   : > { %1944 = vmatprep.subr.msk.mxu0 %vm356_vm1, %v986_v26  ;;  %v1305_v28 = vpop.permute.xlu1 %1304  ;;  %2016 = vmatpush3.msk.msra.mxu1 %vm356_vm1, %v1145_v25 }
  0xbd   : > { %2017 = vmatprep.mubr.msk.f32.mxu1 %vm2202_vm0, %v2201_v0  ;;  %2020 = vmatprep.subr.mxu1 %v2201_v0 }
  0xbe   : > { %v1141_v29 = vpop.permute.xlu0 %1140  ;;  %2018 = vmatmul.mubr.msk.f32.vlgmr.msra.gmra.mrb[10].mxu1 %vm352_vm3, %v2409_v47 }
  0xbf   : > { %2022 = vmatprep.mubr.msk.f32.mxu1 %vm2202_vm0, %v2201_v0 }
  0xc0   : > { %v1303_v31 = vpop.permute.xlu1 %1302 }
  0xc1   : > { %v1309_v40 = vsel %vm1308_vm8, %v1303_v31, %v1305_v28 }
  0xc2   : > { %1941 = vmatmul.mubr.msk.f32.vlgmr.msra.gmra.mrb[0].mxu0 %vm352_vm3, %v2364_v22  ;;  %v1307_v33 = vpop.permute.xlu0 %1306  ;;  %v1147_v22 = vsel %vm1146_vm7, %v1141_v29, %v1143_v27 }
  0xc3   : > { %1945 = vmatpush1.msk.msra.mxu0 %vm356_vm1, %v985_v30  ;;  %1060 = vmatprep.mubr.f32.mxu0 %v2201_v0  ;;  %v1310_v37 = vsel %vm1308_vm8, %v1305_v28, %v1307_v33 }
  0xc4   : > { %1949 = vmatprep.subr.msk.mxu0 %vm356_vm1, %v1148_v32  ;;  %2021 = vmatpush3.msk.msra.mxu1 %vm356_vm1, %v1307_v33  ;;  %v1469_v35 = vpop.permute.xlu1 %1468 }
  0xc5   : > { %2023 = vmatmul.mubr.msk.f32.vlgmr.msra.gmra.mrb[12].mxu1 %vm352_vm3, %v2427_v56  ;;  %2025 = vmatprep.subr.mxu1 %v2201_v0 }
  0xc6   : > { %v1467_v36 = vpop.permute.xlu0 %1466  ;;  %2026 = vmatpush3.msk.msra.mxu1 %vm356_vm1, %v1469_v35  ;;  %2027 = vmatprep.mubr.msk.f32.mxu1 %vm2202_vm0, %v2201_v0 }
  0xc7   : > { %2030 = vmatprep.subr.mxu1 %v2201_v0 }
  0xc8   : > { %v1629_v41 = vpop.permute.xlu1 %1628 }
  0xc9   : > { %2028 = vmatmul.mubr.msk.f32.vlgmr.msra.gmra.mrb[14].mxu1 %vm352_vm3, %v2449_v13 }
  0xca   : > { %1946 = vmatmul.mubr.msk.f32.vlgmr.msra.gmra.mrb[0].mxu0 %vm352_vm3, %v2387_v34  ;;  %v1465_v38 = vpop.permute.xlu0 %1464  ;;  %2032 = vmatprep.mubr.msk.f32.mxu1 %vm2202_vm0, %v2201_v0  ;;  %v1472_v34 = vsel %vm1470_vm9, %v1467_v36, %v1469_v35 }
  0xcb   : > { %1950 = vmatpush1.msk.msra.mxu0 %vm356_vm1, %v1147_v22  ;;  %1222 = vmatprep.mubr.f32.mxu0 %v2201_v0  ;;  %v1471_v42 = vsel %vm1470_vm9, %v1465_v38, %v1467_v36 }
  0xcc   : > { %1954 = vmatprep.subr.msk.mxu0 %vm356_vm1, %v1310_v37 }
  0xce   : > { %v1631_v39 = vpop.permute.xlu0 %1630 }
  0xcf   : > { %2031 = vmatpush3.msk.msra.mxu1 %vm356_vm1, %v1631_v39  ;;  %v1634_v43 = vsel %vm1632_vm10, %v1629_v41, %v1631_v39 }
  0xd0   : > { %2033 = vmatmul.mubr.msk.f32.vlgmr.msra.gmra.mrb[16].mxu1 %vm352_vm3, %v2456_v17 }
  0xd2   : > { %1951 = vmatmul.mubr.msk.f32.vlgmr.msra.gmra.mrb[0].mxu0 %vm352_vm3, %v2409_v47  ;;  %v1627_v47 = vpop.permute.xlu1 %1626 }
  0xd3   : > { %1955 = vmatpush1.msk.msra.mxu0 %vm356_vm1, %v1309_v40  ;;  %1384 = vmatprep.mubr.f32.mxu0 %v2201_v0  ;;  %v1633_v44 = vsel %vm1632_vm10, %v1627_v47, %v1629_v41 }
  0xd4   : > { %1959 = vmatprep.subr.msk.mxu0 %vm356_vm1, %v1472_v34 }
  0xda   : > { %1956 = vmatmul.mubr.msk.f32.vlgmr.msra.gmra.mrb[0].mxu0 %vm352_vm3, %v2427_v56 }
  0xdb   : > { %1960 = vmatpush1.msk.msra.mxu0 %vm356_vm1, %v1471_v42  ;;  %1546 = vmatprep.mubr.f32.mxu0 %v2201_v0 }
  0xdc   : > { %1964 = vmatprep.subr.msk.mxu0 %vm356_vm1, %v1634_v43 }
  0xdf   : > { %v1791_v7 = vpop.permute.xlu0 %1790 }
  0xe2   : > { %1961 = vmatmul.mubr.msk.f32.vlgmr.msra.gmra.mrb[0].mxu0 %vm352_vm3, %v2449_v13 }
  0xe3   : > { %1965 = vmatpush1.msk.msra.mxu0 %vm356_vm1, %v1633_v44  ;;  %1708 = vmatprep.mubr.f32.mxu0 %v2201_v0 }
  0xea   : > { %1966 = vmatmul.mubr.msk.f32.vlgmr.msra.gmra.mrb[0].mxu0 %vm352_vm3, %v2456_v17 }
 0x17b   : > { %v500_v45 = vpop.f32.mrb[0].mxu1 }
 0x17c   : > { %v1994_v56 = vpop.f32.mrb[1].mxu1 }
 0x181   : > { %v650_v46 = vpop.f32.mrb[2].mxu1 }
 0x182   : > { %v651_v48 = vadd.f32 %v650_v46, %v500_v45  ;;  %v1999_v49 = vpop.f32.mrb[3].mxu1 }
 0x185   : > { %v809_v50 = vpop.f32.mrb[4].mxu1 }
 0x186   : > { %v815_v51 = vadd.f32 %v809_v50, %v651_v48  ;;  %v2004_v52 = vpop.f32.mrb[5].mxu1 }
 0x189   : > { %v971_v53 = vpop.f32.mrb[6].mxu1 }
 0x18a   : > { %v977_v54 = vadd.f32 %v971_v53, %v815_v51  ;;  %v2009_v55 = vpop.f32.mrb[7].mxu1 }
 0x18d   : > { %v1133_v13 = vpop.f32.mrb[8].mxu1 }
 0x18e   : > { %v1139_v57 = vadd.f32 %v1133_v13, %v977_v54  ;;  %v2014_v58 = vpop.f32.mrb[9].mxu1 }
 0x191   : > { %v1295_v59 = vpop.f32.mrb[10].mxu1 }
 0x192   : > { %v1301_v0 = vadd.f32 %v1295_v59, %v1139_v57  ;;  %v2019_v60 = vpop.f32.mrb[11].mxu1 }
 0x198   : > { %v1457_v61 = vpop.f32.mrb[12].mxu1 }
 0x199   : > { %v1463_v17 = vadd.f32 %v1457_v61, %v1301_v0  ;;  %v2024_v62 = vpop.f32.mrb[13].mxu1 }
 0x19c   : > { %v1619_v63 = vpop.f32.mrb[14].mxu1 }
 0x19d   : > { %v1625_v6 = vadd.f32 %v1619_v63, %v1463_v17  ;;  %v2029_v4 = vpop.f32.mrb[15].mxu1 }
 0x1a3   : > { %v1781_v5 = vpop.f32.mrb[16].mxu1 }
 0x1a4   : > { %v1787_v8 = vadd.f32 %v1781_v5, %v1625_v6  ;;  %v2034_v9 = vpop.f32.mrb[17].mxu1 }
 0x1a6   : > { %v1795_v10 = vadd.f32 %v1791_v7, %v1787_v8 }
 0x1a8   : > { %1799 = vst.msk [vmem:[%s204_s8 + $0x10] sm:$0xff] %vm1798_vm11, %v1795_v10 }
 0x1bd   : > { %v1710_v11 = vpop.f32.mrb[0].mxu0 }
 0x1be   : > { %v1793_v14 = vadd.f32 %v1791_v7, %v1710_v11  ;;  %v1712_v15 = vpop.f32.mrb[1].mxu0 }
 0x1bf   : > { %v1794_v16 = vadd.f32 %v1791_v7, %v1712_v15 }
 0x1c0   : > { %1796 = vst [vmem:[%s204_s8] sm:$0xff] %v1793_v14 }
 0x1c1   : > { %1797 = vst [vmem:[%s204_s8 + $0x8] sm:$0xff] %v1794_v16 }
 0x1c2   : > { %2145 = shalt.err (!%p2142_p2)
}
 0x1c3   : > { %s2146_s27 = scalar_lea.hbm %s2633_s20, 384  ;;  %s2150_s5 = scalar_lea.hbm %s2679_s4, 768 }
 0x1c4   : > { %p2147_p3 = scmp.ne.s32.totalorder %s2633_s20, %s2146_s27  ;;  %p2151_p8 = scmp.lt.u32.totalorder %s2633_s20, %s2679_s4 }
 0x1c5   : > { %p2152_p11 = scmp.lt.u32.totalorder %s2150_s5, %s2146_s27  ;;  %p2154_p10 = scmp.lt.u32.totalorder %s2146_s27, %s2633_s20 }
 0x1c6   : > { %p2148_p4 = pnand %p2147_p3, %p2276_p5 }
 0x1c7   : > { %p2153_p9 = por %p2152_p11, %p2151_p8 }
 0x1c8   : > { %p2149_p7 = pneg %p2148_p4 }
 0x1c9   : > { %p2155_p12 = por %p2154_p10, %p2153_p9 }
 0x1cb   : > { %p2156_p13 = pnand %p2155_p12, %p2149_p7 }
 0x1cd   : > { %2159 = shalt.err (!%p2156_p13)
}
 0x1ce   : > { %2058 = dma.vmem_to_hbm [thread:$0]  (%p2276_p5), %s2635_s10, 384, %s2633_s20, %s1801_s22  }
 0x1cf PF: > { %p2070_p0 = scmp.ge.s32.totalorder %s2198_s18, 2  ;;  %s1827_s30 = sand.u32 1, %s2186_s15  }
 0x1d0   : > { %s1828_s8 = scalar_lea.sflag [#allocation3], %s1827_s30 }
 0x1d1   : > { %p2065_p1 = pnand %p2070_p0, %p2280_p6 }
 0x1d3   : > { %2181 = dma.done.wait (!%p2065_p1), %s1828_s8, 384  }
 0x1d4   : > { %2183 = vsyncadd (!%p2065_p1), %s1828_s8, 4294966912  ;;  %p15_p2 = scmp.ge.s32.totalorder %s2263_s21, 4   ;;  %s2683_s15 = smov %s2190_s16 }
 0x1d5   : > { %s2684_s16 = smov %s2194_s17  ;;  %s2685_s17 = smov %s2274_s24 }
 0x1d6   : > { %s2686_s18 = smov %s2263_s21  ;;  %17 = sbr.rel (!%p15_p2) target bundleno = 4 (0x4), region = 82 }
 0x1dd   :  { %1833 = vsyncpa [#allocation3], 1 }
 0x1de   :  { %1835 = vsyncpa [#allocation3 + $0x1], 1 }
 0x1df   :  { %1836 = vsyncpa [#allocation4], 1 }
 0x1e0   :  { %1838 = vsyncpa [#allocation4 + $0x1], 1 }

</bundles_post_ra>
